<compile_context>
chip_gen: v7x
topology: tpu7x:2x2x1
jax: 0.10.0
libtpu: 0.0.40
codegen_flags: <defaults>
</compile_context>

<pallas_src>
import functools

import jax
import jax.numpy as jnp
from jax.experimental import pallas as pl
from jax.experimental.pallas import tpu as pltpu

BN_EPS = 1e-5
F_IN, F_IN_PAD = 784, 896      # 7 * 128
H1, H1_PAD = 100, 128
H2, H2_PAD = 50, 128
F_OUT, F_OUT_PAD = 10, 128


def _round_up(n, m):
    return (n + m - 1) // m * m


def mnist_mlp_kernel(x_ref,
                     w1_ref, g1_ref, be1_ref,
                     w2_ref, g2_ref, be2_ref,
                     w3_ref, b3_ref,
                     o_ref,
                     acc1, acc2, ss1, ss2,
                     *, b_true):
    """grid = (phase, batch_tile); phase 0: BN1 stats, 1: BN2 stats, 2: output."""
    p = pl.program_id(0)
    i = pl.program_id(1)
    tb = x_ref.shape[0]
    inv_b = jnp.float32(1.0 / b_true)

    def mm(a, w_ref):
        return jnp.dot(a, w_ref[...], preferred_element_type=jnp.float32)

    def bn_scale_shift(acc, g_ref, be_ref):
        mean = acc[0:1, :] * inv_b
        var = jnp.maximum(acc[1:2, :] * inv_b - mean * mean, 0.0)
        s = g_ref[...] * jax.lax.rsqrt(var + BN_EPS)
        return s, be_ref[...] - mean * s

    # h1 = x @ W1 is needed by every phase (x / W1 are bf16, accumulate f32).
    h1 = mm(x_ref[...], w1_ref)                                   # (tb, 128) f32

    # ---- phase 0: accumulate BN1 batch statistics --------------------------------
    @pl.when(jnp.logical_and(p == 0, i == 0))
    def _():
        acc1[...] = jnp.zeros_like(acc1)

    @pl.when(p == 0)
    def _():
        # Zero-padded batch rows of x give h1 == 0 (no bias), contributing nothing.
        acc1[0:1, :] += jnp.sum(h1, axis=0, keepdims=True)
        acc1[1:2, :] += jnp.sum(h1 * h1, axis=0, keepdims=True)

    # ---- phase 1: finalize BN1 scale/shift, accumulate BN2 batch statistics ------
    @pl.when(jnp.logical_and(p == 1, i == 0))
    def _():
        s, t = bn_scale_shift(acc1, g1_ref, be1_ref)
        ss1[0:1, :] = s
        ss1[1:2, :] = t
        acc2[...] = jnp.zeros_like(acc2)

    @pl.when(p == 1)
    def _():
        a1 = jnp.maximum(h1 * ss1[0:1, :] + ss1[1:2, :], 0.0)
        # Mask zero-padded batch rows (the BN shift would make them nonzero).
        row = jax.lax.broadcasted_iota(jnp.int32, (tb, 1), 0) + i * tb
        a1 = a1 * (row < b_true).astype(jnp.float32)
        h2 = mm(a1.astype(jnp.bfloat16), w2_ref)
        acc2[0:1, :] += jnp.sum(h2, axis=0, keepdims=True)
        acc2[1:2, :] += jnp.sum(h2 * h2, axis=0, keepdims=True)

    # ---- phase 2: finalize BN2 scale/shift, compute the output tile ---------------
    @pl.when(jnp.logical_and(p == 2, i == 0))
    def _():
        s, t = bn_scale_shift(acc2, g2_ref, be2_ref)
        ss2[0:1, :] = s
        ss2[1:2, :] = t

    @pl.when(p == 2)
    def _():
        a1 = jnp.maximum(h1 * ss1[0:1, :] + ss1[1:2, :], 0.0)
        h2 = mm(a1.astype(jnp.bfloat16), w2_ref)
        a2 = jnp.maximum(h2 * ss2[0:1, :] + ss2[1:2, :], 0.0)
        h3 = mm(a2.astype(jnp.bfloat16), w3_ref) + b3_ref[...]
        o_ref[...] = jnp.maximum(h3, 0.0)


def init_params(key):
    """PyTorch-layout params with nn.Linear default init; BN gamma=1, beta=0."""
    def linear(k, fan_in, fan_out):
        kw, kb = jax.random.split(k)
        bound = 1.0 / jnp.sqrt(fan_in)
        w = jax.random.uniform(kw, (fan_out, fan_in), jnp.float32, -bound, bound)
        b = jax.random.uniform(kb, (fan_out,), jnp.float32, -bound, bound)
        return w, b

    k1, k2, k3 = jax.random.split(key, 3)
    w1, b1 = linear(k1, F_IN, H1)
    w2, b2 = linear(k2, H1, H2)
    w3, b3 = linear(k3, H2, F_OUT)
    return dict(w1=w1, b1=b1, g1=jnp.ones((H1,), jnp.float32), be1=jnp.zeros((H1,), jnp.float32),
                w2=w2, b2=b2, g2=jnp.ones((H2,), jnp.float32), be2=jnp.zeros((H2,), jnp.float32),
                w3=w3, b3=b3)


def prepare_params(params):
    """One-time preprocessing: transpose to (in,out), zero-pad to 128-lane multiples,
    cast matmul weights to bf16.  b1/b2 are dropped (dead under training-mode BN)."""
    def padw(w_t, in_pad, out_pad):
        w = jnp.zeros((in_pad, out_pad), jnp.float32)
        w = w.at[:w_t.shape[0], :w_t.shape[1]].set(w_t)
        return w.astype(jnp.bfloat16)

    def padv(v, out_pad):
        return jnp.zeros((1, out_pad), jnp.float32).at[0, :v.shape[0]].set(v)

    return dict(
        w1=padw(params["w1"].T, F_IN_PAD, H1_PAD),
        g1=padv(params["g1"], H1_PAD), be1=padv(params["be1"], H1_PAD),
        w2=padw(params["w2"].T, H1_PAD, H2_PAD),
        g2=padv(params["g2"], H2_PAD), be2=padv(params["be2"], H2_PAD),
        w3=padw(params["w3"].T, H2_PAD, F_OUT_PAD),
        b3=padv(params["b3"], F_OUT_PAD),
    )


def example_mnist_forward(x_nchw, batch_size, kparams, *, tile_batch=None):
    """Equivalent of ExampleMNISTModel.forward(input, batch_size), training-mode BN."""
    B = int(batch_size)                                    # torch .item() -> static int here
    x2 = x_nchw.reshape(B, -1).astype(jnp.float32)         # (B, 784), same as torch .view

    tb = tile_batch if tile_batch is not None else 512     # fits comfortably on v5e/v6e/v7x
    tb = min(_round_up(tb, 8), _round_up(B, 8))
    b_pad = _round_up(B, tb)
    n_tiles = b_pad // tb

    xp = jnp.zeros((b_pad, F_IN_PAD), jnp.float32).at[:B, :F_IN].set(x2).astype(jnp.bfloat16)

    kernel = functools.partial(mnist_mlp_kernel, b_true=B)
    const = lambda p, i: (0, 0)

    out_pad = pl.pallas_call(
        kernel,
        out_shape=jax.ShapeDtypeStruct((b_pad, F_OUT_PAD), jnp.float32),
        grid_spec=pltpu.PrefetchScalarGridSpec(
            num_scalar_prefetch=0,
            grid=(3, n_tiles),
            in_specs=[
                pl.BlockSpec((tb, F_IN_PAD), lambda p, i: (i, 0)),   # x tile (pipelined)
                pl.BlockSpec((F_IN_PAD, H1_PAD), const),             # W1 (VMEM-resident)
                pl.BlockSpec((1, H1_PAD), const),                    # gamma1
                pl.BlockSpec((1, H1_PAD), const),                    # beta1
                pl.BlockSpec((H1_PAD, H2_PAD), const),               # W2
                pl.BlockSpec((1, H2_PAD), const),                    # gamma2
                pl.BlockSpec((1, H2_PAD), const),                    # beta2
                pl.BlockSpec((H2_PAD, F_OUT_PAD), const),            # W3
                pl.BlockSpec((1, F_OUT_PAD), const),                 # b3
            ],
            out_specs=pl.BlockSpec((tb, F_OUT_PAD), lambda p, i: (i, 0)),
            scratch_shapes=[
                pltpu.VMEM((2, H1_PAD), jnp.float32),   # acc1: sum / sumsq of h1
                pltpu.VMEM((2, H2_PAD), jnp.float32),   # acc2: sum / sumsq of h2
                pltpu.VMEM((2, H1_PAD), jnp.float32),   # ss1: BN1 fused scale / shift
                pltpu.VMEM((2, H2_PAD), jnp.float32),   # ss2: BN2 fused scale / shift
            ]),
        compiler_params=pltpu.CompilerParams(
            # Cross-tile BN statistics live in scratch -> both axes must be sequential;
            # a "parallel" batch axis would give each TensorCore its own (wrong) stats.
            dimension_semantics=("arbitrary", "arbitrary")),
    )(xp, kparams["w1"], kparams["g1"], kparams["be1"],
      kparams["w2"], kparams["g2"], kparams["be2"],
      kparams["w3"], kparams["b3"])

    return out_pad[:B, :F_OUT]


def reference_forward(x_nchw, batch_size, kparams):
    """Pure-JAX reference with the same bf16-input / f32-accumulate numerics."""
    B = int(batch_size)
    x = x_nchw.reshape(B, -1).astype(jnp.float32)
    x = jnp.pad(x, ((0, 0), (0, F_IN_PAD - F_IN))).astype(jnp.bfloat16).astype(jnp.float32)

    def bn(h, g, be):
        mu = jnp.mean(h, axis=0, keepdims=True)
        var = jnp.mean((h - mu) ** 2, axis=0, keepdims=True)
        return g * (h - mu) * jax.lax.rsqrt(var + BN_EPS) + be

    w1 = kparams["w1"].astype(jnp.float32)
    w2 = kparams["w2"].astype(jnp.float32)
    w3 = kparams["w3"].astype(jnp.float32)
    h = x @ w1
    h = jnp.maximum(bn(h, kparams["g1"], kparams["be1"]), 0.0)
    h = h.astype(jnp.bfloat16).astype(jnp.float32) @ w2
    h = jnp.maximum(bn(h, kparams["g2"], kparams["be2"]), 0.0)
    h = h.astype(jnp.bfloat16).astype(jnp.float32) @ w3 + kparams["b3"]
    return jnp.maximum(h, 0.0)[:, :F_OUT]


if __name__ == "__main__":
    key = jax.random.PRNGKey(0)
    k_param, k_data1, k_data2 = jax.random.split(key, 3)

    params = init_params(k_param)
    kparams = prepare_params(params)        # one-time transpose / pad / bf16 cast

    # Small demo batch (single batch tile; grid = (3, 1)).
    B = 8
    x = jax.random.normal(k_data1, (B, 1, 28, 28), jnp.float32)
    out = example_mnist_forward(x, jnp.array(B, jnp.int32), kparams)
    out = jax.block_until_ready(out)
    ref = reference_forward(x, B, kparams)
    assert out.shape == (B, 10)
    assert bool(jnp.all(out >= 0.0))                         # final ReLU
    assert bool(jnp.allclose(out, ref, atol=1e-2, rtol=1e-2)), \
        float(jnp.max(jnp.abs(out - ref)))

    # Exercise the multi-tile path (3 batch tiles, last one row-padded) to verify
    # the cross-tile full-batch BN statistics accumulation.
    B2 = 20
    x2 = jax.random.normal(k_data2, (B2, 1, 28, 28), jnp.float32)
    out2 = example_mnist_forward(x2, jnp.array(B2, jnp.int32), kparams, tile_batch=8)
    out2 = jax.block_until_ready(out2)
    ref2 = reference_forward(x2, B2, kparams)
    assert out2.shape == (B2, 10)
    assert bool(jnp.allclose(out2, ref2, atol=1e-2, rtol=1e-2)), \
        float(jnp.max(jnp.abs(out2 - ref2)))

    print("KERNEL_OK")
</pallas_src>

<mosaic_0001>
module attributes {stable_mosaic.version = 11 : i64} {
  func.func @mnist_mlp_kernel(%arg0: i32, %arg1: i32, %arg2: memref<8x896xbf16, #tpu.memory_space<vmem>>, %arg3: memref<896x128xbf16, #tpu.memory_space<vmem>>, %arg4: memref<1x128xf32, #tpu.memory_space<vmem>>, %arg5: memref<1x128xf32, #tpu.memory_space<vmem>>, %arg6: memref<128x128xbf16, #tpu.memory_space<vmem>>, %arg7: memref<1x128xf32, #tpu.memory_space<vmem>>, %arg8: memref<1x128xf32, #tpu.memory_space<vmem>>, %arg9: memref<128x128xbf16, #tpu.memory_space<vmem>>, %arg10: memref<1x128xf32, #tpu.memory_space<vmem>>, %arg11: memref<8x128xf32, #tpu.memory_space<vmem>>, %arg12: memref<2x128xf32, #tpu.memory_space<vmem>>, %arg13: memref<2x128xf32, #tpu.memory_space<vmem>>, %arg14: memref<2x128xf32, #tpu.memory_space<vmem>>, %arg15: memref<2x128xf32, #tpu.memory_space<vmem>>) attributes {dimension_semantics = [#tpu.dimension_semantics<arbitrary>, #tpu.dimension_semantics<arbitrary>], iteration_bounds = array<i64: 3, 1>, scalar_prefetch = 0 : i64, scratch_operands = 4 : i64, tpu.core_type = #tpu.core_type<tc>, window_params = [{transform_indices = @transform_0, window_bounds = array<i64: 8, 896>}, {pipeline_mode = #tpu.pipeline_mode<synchronous>, transform_indices = @transform_1, window_bounds = array<i64: 896, 128>}, {pipeline_mode = #tpu.pipeline_mode<synchronous>, transform_indices = @transform_2, window_bounds = array<i64: 1, 128>}, {pipeline_mode = #tpu.pipeline_mode<synchronous>, transform_indices = @transform_3, window_bounds = array<i64: 1, 128>}, {pipeline_mode = #tpu.pipeline_mode<synchronous>, transform_indices = @transform_4, window_bounds = array<i64: 128, 128>}, {pipeline_mode = #tpu.pipeline_mode<synchronous>, transform_indices = @transform_5, window_bounds = array<i64: 1, 128>}, {pipeline_mode = #tpu.pipeline_mode<synchronous>, transform_indices = @transform_6, window_bounds = array<i64: 1, 128>}, {pipeline_mode = #tpu.pipeline_mode<synchronous>, transform_indices = @transform_7, window_bounds = array<i64: 128, 128>}, {pipeline_mode = #tpu.pipeline_mode<synchronous>, transform_indices = @transform_8, window_bounds = array<i64: 1, 128>}, {transform_indices = @transform_9, window_bounds = array<i64: 8, 128>}]} {
    %c0 = arith.constant 0 : index
    %c0_0 = arith.constant 0 : index
    %0 = vector.load %arg2[%c0, %c0_0] : memref<8x896xbf16, #tpu.memory_space<vmem>>, vector<8x896xbf16>
    %c0_1 = arith.constant 0 : index
    %c0_2 = arith.constant 0 : index
    %1 = vector.load %arg3[%c0_1, %c0_2] : memref<896x128xbf16, #tpu.memory_space<vmem>>, vector<896x128xbf16>
    %cst = arith.constant dense<0.000000e+00> : vector<8x128xf32>
    %2 = tpu.matmul %0, %1, %cst {dimension_numbers = #tpu.dot_dimension_numbers<[1], [0], [0], [1], [0, 0, 1, 1], [], []>} : vector<8x896xbf16>, vector<896x128xbf16>, vector<8x128xf32> -> vector<8x128xf32>
    %c0_i32 = arith.constant 0 : i32
    %3 = arith.cmpi eq, %arg0, %c0_i32 : i32
    %c0_i32_3 = arith.constant 0 : i32
    %4 = arith.cmpi eq, %arg1, %c0_i32_3 : i32
    %5 = arith.andi %3, %4 : i1
    %6 = arith.extui %5 : i1 to i32
    %c0_i32_4 = arith.constant 0 : i32
    %7 = arith.cmpi ne, %6, %c0_i32_4 : i32
    scf.if %7 {
      %cst_17 = arith.constant 0.000000e+00 : f32
      %27 = vector.broadcast %cst_17 : f32 to vector<2x128xf32>
      %c0_18 = arith.constant 0 : index
      %c0_19 = arith.constant 0 : index
      %28 = vector.load %arg12[%c0_18, %c0_19] : memref<2x128xf32, #tpu.memory_space<vmem>>, vector<2x128xf32>
      tpu.vector_store %arg12[%c0_18, %c0_19], %27 {strides = array<i32>} : memref<2x128xf32, #tpu.memory_space<vmem>>, vector<2x128xf32>,
    } else {
    }
    %c0_i32_5 = arith.constant 0 : i32
    %8 = arith.cmpi eq, %arg0, %c0_i32_5 : i32
    %9 = arith.extui %8 : i1 to i32
    %c0_i32_6 = arith.constant 0 : i32
    %10 = arith.cmpi ne, %9, %c0_i32_6 : i32
    scf.if %10 {
      %c0_17 = arith.constant 0 : index
      %c0_18 = arith.constant 0 : index
      %27 = vector.load %arg12[%c0_17, %c0_18] : memref<2x128xf32, #tpu.memory_space<vmem>>, vector<1x128xf32>
      %cst_19 = arith.constant dense<0.000000e+00> : vector<128xf32>
      %28 = vector.multi_reduction <add>, %2, %cst_19 [0] : vector<8x128xf32> to vector<128xf32>
      %29 = vector.shape_cast %28 : vector<128xf32> to vector<1x128xf32>
      %30 = arith.addf %27, %29 : vector<1x128xf32>
      %c0_20 = arith.constant 0 : index
      %c0_21 = arith.constant 0 : index
      %31 = vector.load %arg12[%c0_20, %c0_21] : memref<2x128xf32, #tpu.memory_space<vmem>>, vector<1x128xf32>
      tpu.vector_store %arg12[%c0_20, %c0_21], %30 {strides = array<i32>} : memref<2x128xf32, #tpu.memory_space<vmem>>, vector<1x128xf32>,
      %c1 = arith.constant 1 : index
      %c0_22 = arith.constant 0 : index
      %32 = vector.load %arg12[%c1, %c0_22] : memref<2x128xf32, #tpu.memory_space<vmem>>, vector<1x128xf32>
      %33 = arith.mulf %2, %2 : vector<8x128xf32>
      %cst_23 = arith.constant dense<0.000000e+00> : vector<128xf32>
      %34 = vector.multi_reduction <add>, %33, %cst_23 [0] : vector<8x128xf32> to vector<128xf32>
      %35 = vector.shape_cast %34 : vector<128xf32> to vector<1x128xf32>
      %36 = arith.addf %32, %35 : vector<1x128xf32>
      %c1_24 = arith.constant 1 : index
      %c0_25 = arith.constant 0 : index
      %37 = vector.load %arg12[%c1_24, %c0_25] : memref<2x128xf32, #tpu.memory_space<vmem>>, vector<1x128xf32>
      tpu.vector_store %arg12[%c1_24, %c0_25], %36 {strides = array<i32>} : memref<2x128xf32, #tpu.memory_space<vmem>>, vector<1x128xf32>,
    } else {
    }
    %c1_i32 = arith.constant 1 : i32
    %11 = arith.cmpi eq, %arg0, %c1_i32 : i32
    %c0_i32_7 = arith.constant 0 : i32
    %12 = arith.cmpi eq, %arg1, %c0_i32_7 : i32
    %13 = arith.andi %11, %12 : i1
    %14 = arith.extui %13 : i1 to i32
    %cst_8 = arith.constant 1.250000e-01 : f32
    %c0_i32_9 = arith.constant 0 : i32
    %15 = arith.cmpi ne, %14, %c0_i32_9 : i32
    scf.if %15 {
      %c0_17 = arith.constant 0 : index
      %c0_18 = arith.constant 0 : index
      %27 = vector.load %arg12[%c0_17, %c0_18] : memref<2x128xf32, #tpu.memory_space<vmem>>, vector<1x128xf32>
      %28 = vector.broadcast %cst_8 : f32 to vector<1x128xf32>
      %29 = arith.mulf %27, %28 : vector<1x128xf32>
      %c1 = arith.constant 1 : index
      %c0_19 = arith.constant 0 : index
      %30 = vector.load %arg12[%c1, %c0_19] : memref<2x128xf32, #tpu.memory_space<vmem>>, vector<1x128xf32>
      %31 = vector.broadcast %cst_8 : f32 to vector<1x128xf32>
      %32 = arith.mulf %30, %31 : vector<1x128xf32>
      %33 = arith.mulf %29, %29 : vector<1x128xf32>
      %34 = arith.subf %32, %33 : vector<1x128xf32>
      %cst_20 = arith.constant 0.000000e+00 : f32
      %35 = vector.broadcast %cst_20 : f32 to vector<1x128xf32>
      %36 = arith.maximumf %34, %35 : vector<1x128xf32>
      %c0_21 = arith.constant 0 : index
      %c0_22 = arith.constant 0 : index
      %37 = vector.load %arg4[%c0_21, %c0_22] : memref<1x128xf32, #tpu.memory_space<vmem>>, vector<1x128xf32>
      %cst_23 = arith.constant 9.99999974E-6 : f32
      %38 = vector.broadcast %cst_23 : f32 to vector<1x128xf32>
      %39 = arith.addf %36, %38 : vector<1x128xf32>
      %40 = math.rsqrt %39 : vector<1x128xf32>
      %41 = arith.mulf %37, %40 : vector<1x128xf32>
      %c0_24 = arith.constant 0 : index
      %c0_25 = arith.constant 0 : index
      %42 = vector.load %arg5[%c0_24, %c0_25] : memref<1x128xf32, #tpu.memory_space<vmem>>, vector<1x128xf32>
      %43 = arith.mulf %29, %41 : vector<1x128xf32>
      %44 = arith.subf %42, %43 : vector<1x128xf32>
      %c0_26 = arith.constant 0 : index
      %c0_27 = arith.constant 0 : index
      %45 = vector.load %arg14[%c0_26, %c0_27] : memref<2x128xf32, #tpu.memory_space<vmem>>, vector<1x128xf32>
      tpu.vector_store %arg14[%c0_26, %c0_27], %41 {strides = array<i32>} : memref<2x128xf32, #tpu.memory_space<vmem>>, vector<1x128xf32>,
      %c1_28 = arith.constant 1 : index
      %c0_29 = arith.constant 0 : index
      %46 = vector.load %arg14[%c1_28, %c0_29] : memref<2x128xf32, #tpu.memory_space<vmem>>, vector<1x128xf32>
      tpu.vector_store %arg14[%c1_28, %c0_29], %44 {strides = array<i32>} : memref<2x128xf32, #tpu.memory_space<vmem>>, vector<1x128xf32>,
      %cst_30 = arith.constant 0.000000e+00 : f32
      %47 = vector.broadcast %cst_30 : f32 to vector<2x128xf32>
      %c0_31 = arith.constant 0 : index
      %c0_32 = arith.constant 0 : index
      %48 = vector.load %arg13[%c0_31, %c0_32] : memref<2x128xf32, #tpu.memory_space<vmem>>, vector<2x128xf32>
      tpu.vector_store %arg13[%c0_31, %c0_32], %47 {strides = array<i32>} : memref<2x128xf32, #tpu.memory_space<vmem>>, vector<2x128xf32>,
    } else {
    }
    %c1_i32_10 = arith.constant 1 : i32
    %16 = arith.cmpi eq, %arg0, %c1_i32_10 : i32
    %17 = arith.extui %16 : i1 to i32
    %c0_i32_11 = arith.constant 0 : i32
    %18 = arith.cmpi ne, %17, %c0_i32_11 : i32
    scf.if %18 {
      %c0_17 = arith.constant 0 : index
      %c0_18 = arith.constant 0 : index
      %27 = vector.load %arg14[%c0_17, %c0_18] : memref<2x128xf32, #tpu.memory_space<vmem>>, vector<1x128xf32>
      %28 = vector.broadcast %27 : vector<1x128xf32> to vector<8x128xf32>
      %29 = arith.mulf %2, %28 : vector<8x128xf32>
      %c1 = arith.constant 1 : index
      %c0_19 = arith.constant 0 : index
      %30 = vector.load %arg14[%c1, %c0_19] : memref<2x128xf32, #tpu.memory_space<vmem>>, vector<1x128xf32>
      %31 = vector.broadcast %30 : vector<1x128xf32> to vector<8x128xf32>
      %32 = arith.addf %29, %31 : vector<8x128xf32>
      %cst_20 = arith.constant 0.000000e+00 : f32
      %33 = vector.broadcast %cst_20 : f32 to vector<8x128xf32>
      %34 = arith.maximumf %32, %33 : vector<8x128xf32>
      %35 = tpu.iota {dimensions = array<i32: 0>} : vector<8x1xi32>
      %c8_i32 = arith.constant 8 : i32
      %36 = arith.muli %arg1, %c8_i32 : i32
      %37 = vector.broadcast %36 : i32 to vector<8x1xi32>
      %38 = arith.addi %35, %37 : vector<8x1xi32>
      %c8_i32_21 = arith.constant 8 : i32
      %39 = vector.broadcast %c8_i32_21 : i32 to vector<8x1xi32>
      %40 = arith.cmpi slt, %38, %39 : vector<8x1xi32>
      %41 = arith.extui %40 : vector<8x1xi1> to vector<8x1xi32>
      %42 = arith.sitofp %41 : vector<8x1xi32> to vector<8x1xf32>
      %43 = vector.broadcast %42 : vector<8x1xf32> to vector<8x128xf32>
      %44 = arith.mulf %34, %43 : vector<8x128xf32>
      %45 = arith.truncf %44 : vector<8x128xf32> to vector<8x128xbf16>
      %c0_22 = arith.constant 0 : index
      %c0_23 = arith.constant 0 : index
      %46 = vector.load %arg6[%c0_22, %c0_23] : memref<128x128xbf16, #tpu.memory_space<vmem>>, vector<128x128xbf16>
      %cst_24 = arith.constant dense<0.000000e+00> : vector<8x128xf32>
      %47 = tpu.matmul %45, %46, %cst_24 {dimension_numbers = #tpu.dot_dimension_numbers<[1], [0], [0], [1], [0, 0, 1, 1], [], []>} : vector<8x128xbf16>, vector<128x128xbf16>, vector<8x128xf32> -> vector<8x128xf32>
      %c0_25 = arith.constant 0 : index
      %c0_26 = arith.constant 0 : index
      %48 = vector.load %arg13[%c0_25, %c0_26] : memref<2x128xf32, #tpu.memory_space<vmem>>, vector<1x128xf32>
      %cst_27 = arith.constant dense<0.000000e+00> : vector<128xf32>
      %49 = vector.multi_reduction <add>, %47, %cst_27 [0] : vector<8x128xf32> to vector<128xf32>
      %50 = vector.shape_cast %49 : vector<128xf32> to vector<1x128xf32>
      %51 = arith.addf %48, %50 : vector<1x128xf32>
      %c0_28 = arith.constant 0 : index
      %c0_29 = arith.constant 0 : index
      %52 = vector.load %arg13[%c0_28, %c0_29] : memref<2x128xf32, #tpu.memory_space<vmem>>, vector<1x128xf32>
      tpu.vector_store %arg13[%c0_28, %c0_29], %51 {strides = array<i32>} : memref<2x128xf32, #tpu.memory_space<vmem>>, vector<1x128xf32>,
      %c1_30 = arith.constant 1 : index
      %c0_31 = arith.constant 0 : index
      %53 = vector.load %arg13[%c1_30, %c0_31] : memref<2x128xf32, #tpu.memory_space<vmem>>, vector<1x128xf32>
      %54 = arith.mulf %47, %47 : vector<8x128xf32>
      %cst_32 = arith.constant dense<0.000000e+00> : vector<128xf32>
      %55 = vector.multi_reduction <add>, %54, %cst_32 [0] : vector<8x128xf32> to vector<128xf32>
      %56 = vector.shape_cast %55 : vector<128xf32> to vector<1x128xf32>
      %57 = arith.addf %53, %56 : vector<1x128xf32>
      %c1_33 = arith.constant 1 : index
      %c0_34 = arith.constant 0 : index
      %58 = vector.load %arg13[%c1_33, %c0_34] : memref<2x128xf32, #tpu.memory_space<vmem>>, vector<1x128xf32>
      tpu.vector_store %arg13[%c1_33, %c0_34], %57 {strides = array<i32>} : memref<2x128xf32, #tpu.memory_space<vmem>>, vector<1x128xf32>,
    } else {
    }
    %c2_i32 = arith.constant 2 : i32
    %19 = arith.cmpi eq, %arg0, %c2_i32 : i32
    %c0_i32_12 = arith.constant 0 : i32
    %20 = arith.cmpi eq, %arg1, %c0_i32_12 : i32
    %21 = arith.andi %19, %20 : i1
    %22 = arith.extui %21 : i1 to i32
    %cst_13 = arith.constant 1.250000e-01 : f32
    %c0_i32_14 = arith.constant 0 : i32
    %23 = arith.cmpi ne, %22, %c0_i32_14 : i32
    scf.if %23 {
      %c0_17 = arith.constant 0 : index
      %c0_18 = arith.constant 0 : index
      %27 = vector.load %arg13[%c0_17, %c0_18] : memref<2x128xf32, #tpu.memory_space<vmem>>, vector<1x128xf32>
      %28 = vector.broadcast %cst_13 : f32 to vector<1x128xf32>
      %29 = arith.mulf %27, %28 : vector<1x128xf32>
      %c1 = arith.constant 1 : index
      %c0_19 = arith.constant 0 : index
      %30 = vector.load %arg13[%c1, %c0_19] : memref<2x128xf32, #tpu.memory_space<vmem>>, vector<1x128xf32>
      %31 = vector.broadcast %cst_13 : f32 to vector<1x128xf32>
      %32 = arith.mulf %30, %31 : vector<1x128xf32>
      %33 = arith.mulf %29, %29 : vector<1x128xf32>
      %34 = arith.subf %32, %33 : vector<1x128xf32>
      %cst_20 = arith.constant 0.000000e+00 : f32
      %35 = vector.broadcast %cst_20 : f32 to vector<1x128xf32>
      %36 = arith.maximumf %34, %35 : vector<1x128xf32>
      %c0_21 = arith.constant 0 : index
      %c0_22 = arith.constant 0 : index
      %37 = vector.load %arg7[%c0_21, %c0_22] : memref<1x128xf32, #tpu.memory_space<vmem>>, vector<1x128xf32>
      %cst_23 = arith.constant 9.99999974E-6 : f32
      %38 = vector.broadcast %cst_23 : f32 to vector<1x128xf32>
      %39 = arith.addf %36, %38 : vector<1x128xf32>
      %40 = math.rsqrt %39 : vector<1x128xf32>
      %41 = arith.mulf %37, %40 : vector<1x128xf32>
      %c0_24 = arith.constant 0 : index
      %c0_25 = arith.constant 0 : index
      %42 = vector.load %arg8[%c0_24, %c0_25] : memref<1x128xf32, #tpu.memory_space<vmem>>, vector<1x128xf32>
      %43 = arith.mulf %29, %41 : vector<1x128xf32>
      %44 = arith.subf %42, %43 : vector<1x128xf32>
      %c0_26 = arith.constant 0 : index
      %c0_27 = arith.constant 0 : index
      %45 = vector.load %arg15[%c0_26, %c0_27] : memref<2x128xf32, #tpu.memory_space<vmem>>, vector<1x128xf32>
      tpu.vector_store %arg15[%c0_26, %c0_27], %41 {strides = array<i32>} : memref<2x128xf32, #tpu.memory_space<vmem>>, vector<1x128xf32>,
      %c1_28 = arith.constant 1 : index
      %c0_29 = arith.constant 0 : index
      %46 = vector.load %arg15[%c1_28, %c0_29] : memref<2x128xf32, #tpu.memory_space<vmem>>, vector<1x128xf32>
      tpu.vector_store %arg15[%c1_28, %c0_29], %44 {strides = array<i32>} : memref<2x128xf32, #tpu.memory_space<vmem>>, vector<1x128xf32>,
    } else {
    }
    %c2_i32_15 = arith.constant 2 : i32
    %24 = arith.cmpi eq, %arg0, %c2_i32_15 : i32
    %25 = arith.extui %24 : i1 to i32
    %c0_i32_16 = arith.constant 0 : i32
    %26 = arith.cmpi ne, %25, %c0_i32_16 : i32
    scf.if %26 {
      %c0_17 = arith.constant 0 : index
      %c0_18 = arith.constant 0 : index
      %27 = vector.load %arg14[%c0_17, %c0_18] : memref<2x128xf32, #tpu.memory_space<vmem>>, vector<1x128xf32>
      %28 = vector.broadcast %27 : vector<1x128xf32> to vector<8x128xf32>
      %29 = arith.mulf %2, %28 : vector<8x128xf32>
      %c1 = arith.constant 1 : index
      %c0_19 = arith.constant 0 : index
      %30 = vector.load %arg14[%c1, %c0_19] : memref<2x128xf32, #tpu.memory_space<vmem>>, vector<1x128xf32>
      %31 = vector.broadcast %30 : vector<1x128xf32> to vector<8x128xf32>
      %32 = arith.addf %29, %31 : vector<8x128xf32>
      %cst_20 = arith.constant 0.000000e+00 : f32
      %33 = vector.broadcast %cst_20 : f32 to vector<8x128xf32>
      %34 = arith.maximumf %32, %33 : vector<8x128xf32>
      %35 = arith.truncf %34 : vector<8x128xf32> to vector<8x128xbf16>
      %c0_21 = arith.constant 0 : index
      %c0_22 = arith.constant 0 : index
      %36 = vector.load %arg6[%c0_21, %c0_22] : memref<128x128xbf16, #tpu.memory_space<vmem>>, vector<128x128xbf16>
      %cst_23 = arith.constant dense<0.000000e+00> : vector<8x128xf32>
      %37 = tpu.matmul %35, %36, %cst_23 {dimension_numbers = #tpu.dot_dimension_numbers<[1], [0], [0], [1], [0, 0, 1, 1], [], []>} : vector<8x128xbf16>, vector<128x128xbf16>, vector<8x128xf32> -> vector<8x128xf32>
      %c0_24 = arith.constant 0 : index
      %c0_25 = arith.constant 0 : index
      %38 = vector.load %arg15[%c0_24, %c0_25] : memref<2x128xf32, #tpu.memory_space<vmem>>, vector<1x128xf32>
      %39 = vector.broadcast %38 : vector<1x128xf32> to vector<8x128xf32>
      %40 = arith.mulf %37, %39 : vector<8x128xf32>
      %c1_26 = arith.constant 1 : index
      %c0_27 = arith.constant 0 : index
      %41 = vector.load %arg15[%c1_26, %c0_27] : memref<2x128xf32, #tpu.memory_space<vmem>>, vector<1x128xf32>
      %42 = vector.broadcast %41 : vector<1x128xf32> to vector<8x128xf32>
      %43 = arith.addf %40, %42 : vector<8x128xf32>
      %cst_28 = arith.constant 0.000000e+00 : f32
      %44 = vector.broadcast %cst_28 : f32 to vector<8x128xf32>
      %45 = arith.maximumf %43, %44 : vector<8x128xf32>
      %46 = arith.truncf %45 : vector<8x128xf32> to vector<8x128xbf16>
      %c0_29 = arith.constant 0 : index
      %c0_30 = arith.constant 0 : index
      %47 = vector.load %arg9[%c0_29, %c0_30] : memref<128x128xbf16, #tpu.memory_space<vmem>>, vector<128x128xbf16>
      %cst_31 = arith.constant dense<0.000000e+00> : vector<8x128xf32>
      %48 = tpu.matmul %46, %47, %cst_31 {dimension_numbers = #tpu.dot_dimension_numbers<[1], [0], [0], [1], [0, 0, 1, 1], [], []>} : vector<8x128xbf16>, vector<128x128xbf16>, vector<8x128xf32> -> vector<8x128xf32>
      %c0_32 = arith.constant 0 : index
      %c0_33 = arith.constant 0 : index
      %49 = vector.load %arg10[%c0_32, %c0_33] : memref<1x128xf32, #tpu.memory_space<vmem>>, vector<1x128xf32>
      %50 = vector.broadcast %49 : vector<1x128xf32> to vector<8x128xf32>
      %51 = arith.addf %48, %50 : vector<8x128xf32>
      %cst_34 = arith.constant 0.000000e+00 : f32
      %52 = vector.broadcast %cst_34 : f32 to vector<8x128xf32>
      %53 = arith.maximumf %51, %52 : vector<8x128xf32>
      %c0_35 = arith.constant 0 : index
      %c0_36 = arith.constant 0 : index
      %54 = vector.load %arg11[%c0_35, %c0_36] : memref<8x128xf32, #tpu.memory_space<vmem>>, vector<8x128xf32>
      tpu.vector_store %arg11[%c0_35, %c0_36], %53 {strides = array<i32>} : memref<8x128xf32, #tpu.memory_space<vmem>>, vector<8x128xf32>,
    } else {
    }
    return
  }
  func.func @transform_0(%arg0: i32, %arg1: i32) -> (i32, i32) {
    %c0_i32 = arith.constant 0 : i32
    %c0_i32_0 = arith.constant 0 : i32
    return %arg1, %c0_i32 : i32, i32
  }
  func.func @transform_1(%arg0: i32, %arg1: i32) -> (i32, i32) {
    %c0_i32 = arith.constant 0 : i32
    %c0_i32_0 = arith.constant 0 : i32
    %c0_i32_1 = arith.constant 0 : i32
    return %c0_i32, %c0_i32_0 : i32, i32
  }
  func.func @transform_2(%arg0: i32, %arg1: i32) -> (i32, i32) {
    %c0_i32 = arith.constant 0 : i32
    %c0_i32_0 = arith.constant 0 : i32
    %c0_i32_1 = arith.constant 0 : i32
    return %c0_i32, %c0_i32_0 : i32, i32
  }
  func.func @transform_3(%arg0: i32, %arg1: i32) -> (i32, i32) {
    %c0_i32 = arith.constant 0 : i32
    %c0_i32_0 = arith.constant 0 : i32
    %c0_i32_1 = arith.constant 0 : i32
    return %c0_i32, %c0_i32_0 : i32, i32
  }
  func.func @transform_4(%arg0: i32, %arg1: i32) -> (i32, i32) {
    %c0_i32 = arith.constant 0 : i32
    %c0_i32_0 = arith.constant 0 : i32
    %c0_i32_1 = arith.constant 0 : i32
    return %c0_i32, %c0_i32_0 : i32, i32
  }
  func.func @transform_5(%arg0: i32, %arg1: i32) -> (i32, i32) {
    %c0_i32 = arith.constant 0 : i32
    %c0_i32_0 = arith.constant 0 : i32
    %c0_i32_1 = arith.constant 0 : i32
    return %c0_i32, %c0_i32_0 : i32, i32
  }
  func.func @transform_6(%arg0: i32, %arg1: i32) -> (i32, i32) {
    %c0_i32 = arith.constant 0 : i32
    %c0_i32_0 = arith.constant 0 : i32
    %c0_i32_1 = arith.constant 0 : i32
    return %c0_i32, %c0_i32_0 : i32, i32
  }
  func.func @transform_7(%arg0: i32, %arg1: i32) -> (i32, i32) {
    %c0_i32 = arith.constant 0 : i32
    %c0_i32_0 = arith.constant 0 : i32
    %c0_i32_1 = arith.constant 0 : i32
    return %c0_i32, %c0_i32_0 : i32, i32
  }
  func.func @transform_8(%arg0: i32, %arg1: i32) -> (i32, i32) {
    %c0_i32 = arith.constant 0 : i32
    %c0_i32_0 = arith.constant 0 : i32
    %c0_i32_1 = arith.constant 0 : i32
    return %c0_i32, %c0_i32_0 : i32, i32
  }
  func.func @transform_9(%arg0: i32, %arg1: i32) -> (i32, i32) {
    %c0_i32 = arith.constant 0 : i32
    %c0_i32_0 = arith.constant 0 : i32
    return %arg1, %c0_i32 : i32, i32
  }
}

</mosaic_0001>

<bundles_post_ra>
// kernel: tpu_custom_call.1
= control target key start
LH: loop header
LB: loop body
LE: loop exit
PB: predicated region body
PF: predicated region fallthrough
CT: control target
= control target key end

     0   :  { %14 = vsyncpa [#allocation7], 0  ;;  %s2515_s0 = inlined_call_operand.hbm [shape: bf16[8,896], index: 0, kind: input, shape index: {}]   ;;  %s2516_s1 = inlined_call_operand.hbm [shape: bf16[896,128], index: 1, kind: input, shape index: {}]   ;;  %s2517_s2 = inlined_call_operand.vmem [shape: f32[1,128], index: 2, kind: input, shape index: {}]   ;;  %s2518_s3 = inlined_call_operand.vmem [shape: f32[1,128], index: 3, kind: input, shape index: {}]   ;;  %s2519_s4 = inlined_call_operand.hbm [shape: bf16[128,128], index: 4, kind: input, shape index: {}]   ;;  %s2520_s5 = inlined_call_operand.vmem [shape: f32[1,128], index: 5, kind: input, shape index: {}]   ;;  %s2521_s6 = inlined_call_operand.vmem [shape: f32[1,128], index: 6, kind: input, shape index: {}]   ;;  %s2522_s7 = inlined_call_operand.hbm [shape: bf16[128,128], index: 7, kind: input, shape index: {}]   ;;  %s2523_s8 = inlined_call_operand.vmem [shape: f32[1,128], index: 8, kind: input, shape index: {}]   ;;  %s2524_s9 = inlined_call_operand.hbm [shape: f32[8,128], index: 9, kind: output, shape index: {}]  }
   0x1   :  { %15 = vsyncpa [#allocation10], 0 }
   0x2   :  { %16 = vsyncpa [#allocation13], 0 }
   0x3   :  { %17 = vsyncpa [#allocation8], 0  ;;  %s2294_s30 = smov 0   ;;  %s2296_s10 = smov 0  }
   0x4   :  { %s2298_s11 = smov 0  }
   0x5 LB: > { %2532 = sst [smem:[#allocation19_spill]] %s2223_s10  ;;  %s2229_s12 = smov [#allocation9]   ;;  %s2227_s11 = sphi %s2298_s11, %s23_s11   ;;  %s2223_s10 = sphi %s2296_s10, %s2544_s10   ;;  %s2219_s30 = sphi %s2294_s30, %s2543_s30  }
   0x6   : > { %s286_s13 = sshll.u32 %s2229_s12, 4  ;;  %s2527_s14 = sadd.s32 4294967295, %s2227_s11   ;;  %s2318_s13 = int_to_ptr.vmem [resolvable:$true] %s286_s13 }
   0x7   : > { %p1579_p0 = scmp.ge.s32.totalorder %s2227_s11, 1  ;;  %p260_p1 = scmp.lt.s32.totalorder %s2227_s11, 4 }
   0x8   : > { %p2314_p2 = scmp.eq.s32.totalorder %s2527_s14, 0  ;;  %s35_s18 = sadd.s32 1, %s2223_s10 }
   0x9   : > { %p2320_p3 = pnand %p1579_p0, %p260_p1  ;;  %p2333_p6 = scmp.ge.s32.totalorder %s35_s18, 3 }
   0xa   : > { %s2533_s15 = scalar_select %p2314_p2, 1, 0 }
   0xb   : > { %s2534_s16 = scalar_select %p2320_p3, 1, 0 }
   0xc   : > { %p1898_p4 = pneg %p2320_p3  ;;  %s2230_s20 = smov [#allocation6]  }
   0xd   : > { %s276_s21 = sshll.u32 %s2230_s20, 4  ;;  %s2051_s24 = scalar_lea.hbm %s2516_s1, 7168  ;;  %s277_s21 = int_to_ptr.vmem [resolvable:$true] %s276_s21 }
   0xe   : > { %p2328_p5 = pnand %p2314_p2, %p1898_p4  ;;  %p2052_p7 = scmp.ne.s32.totalorder %s2516_s1, %s2051_s24 }
   0xf   : > { %p2058_p11 = scmp.lt.u32.totalorder %s2051_s24, %s2516_s1 }
  0x10   : > { %p2345_p8 = pneg %p2328_p5 }
  0x12   : > { %p2054_p9 = pnand %p2345_p8, %p2052_p7 }
  0x14   : > { %p2055_p10 = pneg %p2054_p9 }
  0x16   : > { %p2060_p12 = pnand %p2058_p11, %p2055_p10 }
  0x18   : > { %2063 = shalt.err (!%p2060_p12)
}
  0x19   : > { %s2064_s12 = scalar_lea.vmem %s2318_s13, 7168  ;;  %p2072_p4 = scmp.lt.s32.totalorder %s2318_s13, %s2318_s13 }
  0x1a   : > { %p2065_p13 = scmp.ne.s32.totalorder %s2318_s13, %s2064_s12  ;;  %p2073_p2 = scmp.lt.s32.totalorder %s2064_s12, %s2064_s12 }
  0x1c   : > { %p2067_p0 = pnand %p2065_p13, %p2345_p8  ;;  %p2074_p7 = por %p2073_p2, %p2072_p4 }
  0x1e   : > { %p2068_p1 = pneg %p2067_p0 }
  0x20   : > { %p2075_p9 = pnand %p2074_p7, %p2068_p1 }
  0x22   : > { %2078 = shalt.err (!%p2075_p9)
}
  0x23   : > { %s2530_s20 = smov 64   ;;  %s2232_s22 = smov 4  }
  0x24   : > { %1904 = dma.hbm_to_vmem [thread:$0]  (!%p2328_p5), %s2516_s1, 7168, %s2318_s13, [#allocation10], %s2530_s20, %s2530_s20, %s2232_s22  }
  0x25   : > { %s2546_s18 = smov (%p2333_p6, %s35_s18), 0  ;;  %s2079_s28 = scalar_lea.hbm %s2515_s0, 448 }
  0x26   : > { %p2080_p2 = scmp.ne.s32.totalorder %s2515_s0, %s2079_s28  ;;  %p2086_p12 = scmp.lt.u32.totalorder %s2079_s28, %s2515_s0 }
  0x28   : > { %p2082_p10 = pnand %p2080_p2, %p2345_p8 }
  0x2a   : > { %p2083_p11 = pneg %p2082_p10 }
  0x2c   : > { %p2088_p13 = pnand %p2086_p12, %p2083_p11 }
  0x2e   : > { %2091 = shalt.err (!%p2088_p13)
}
  0x2f   : > { %s2092_s13 = scalar_lea.vmem %s277_s21, 448  ;;  %p2100_p4 = scmp.lt.s32.totalorder %s277_s21, %s277_s21 }
  0x30   : > { %p2093_p6 = scmp.ne.s32.totalorder %s277_s21, %s2092_s13  ;;  %p2101_p7 = scmp.lt.s32.totalorder %s2092_s13, %s2092_s13 }
  0x32   : > { %p2095_p0 = pnand %p2093_p6, %p2345_p8  ;;  %p2102_p9 = por %p2101_p7, %p2100_p4 }
  0x34   : > { %p2096_p1 = pneg %p2095_p0 }
  0x36   : > { %p2103_p3 = pnand %p2102_p9, %p2096_p1 }
  0x38   : > { %2106 = shalt.err (!%p2103_p3)
}
  0x39   : > { %1901 = dma.hbm_to_vmem [thread:$0]  (!%p2328_p5), %s2515_s0, 448, %s277_s21, [#allocation7]  }
  0x3a   : > { %s2233_s10 = smov [#allocation11]   ;;  %s2234_s24 = smov [#allocation12]  }
  0x3b   : > { %s305_s14 = sshll.u32 %s2233_s10, 4  ;;  %s324_s25 = sshll.u32 %s2234_s24, 4  ;;  %s306_s14 = int_to_ptr.vmem [resolvable:$true] %s305_s14  ;;  %s325_s25 = int_to_ptr.vmem [resolvable:$true] %s324_s25 }
  0x3c   : > { %s2107_s29 = scalar_lea.hbm %s2519_s4, 1024 }
  0x3d   : > { %p2108_p3 = scmp.ne.s32.totalorder %s2519_s4, %s2107_s29  ;;  %p2114_p11 = scmp.lt.u32.totalorder %s2107_s29, %s2519_s4 }
  0x3f   : > { %p2110_p2 = pnand %p2108_p3, %p2345_p8 }
  0x41   : > { %p2111_p10 = pneg %p2110_p2 }
  0x43   : > { %p2116_p12 = pnand %p2114_p11, %p2111_p10 }
  0x45   : > { %2119 = shalt.err (!%p2116_p12)
}
  0x46   : > { %s2120_s21 = scalar_lea.vmem %s306_s14, 1024  ;;  %p2128_p1 = scmp.lt.s32.totalorder %s306_s14, %s306_s14 }
  0x47   : > { %p2121_p13 = scmp.ne.s32.totalorder %s306_s14, %s2120_s21  ;;  %p2129_p4 = scmp.lt.s32.totalorder %s2120_s21, %s2120_s21 }
  0x49   : > { %p2123_p6 = pnand %p2121_p13, %p2345_p8  ;;  %p2130_p7 = por %p2129_p4, %p2128_p1 }
  0x4b   : > { %p2124_p0 = pneg %p2123_p6 }
  0x4d   : > { %p2131_p9 = pnand %p2130_p7, %p2124_p0 }
  0x4f   : > { %2134 = shalt.err (!%p2131_p9)
}
  0x50   : > { %s2538_s23 = smov 64   ;;  %s2135_s28 = scalar_lea.hbm %s2522_s7, 1024 }
  0x51   : > { %1907 = dma.hbm_to_vmem [thread:$0]  (!%p2328_p5), %s2519_s4, 1024, %s306_s14, [#allocation10], %s2538_s23, %s2538_s23, %s2232_s22  }
  0x52   : > { %p2136_p3 = scmp.ne.s32.totalorder %s2522_s7, %s2135_s28  ;;  %p2142_p11 = scmp.lt.u32.totalorder %s2135_s28, %s2522_s7 }
  0x54   : > { %p2138_p2 = pnand %p2136_p3, %p2345_p8 }
  0x56   : > { %p2139_p10 = pneg %p2138_p2 }
  0x58   : > { %p2144_p12 = pnand %p2142_p11, %p2139_p10 }
  0x5a   : > { %2147 = shalt.err (!%p2144_p12)
}
  0x5b   : > { %s2148_s21 = scalar_lea.vmem %s325_s25, 1024  ;;  %p2156_p1 = scmp.lt.s32.totalorder %s325_s25, %s325_s25 }
  0x5c   : > { %p2149_p13 = scmp.ne.s32.totalorder %s325_s25, %s2148_s21  ;;  %p2157_p4 = scmp.lt.s32.totalorder %s2148_s21, %s2148_s21 }
  0x5e   : > { %p2151_p6 = pnand %p2149_p13, %p2345_p8  ;;  %p2158_p7 = por %p2157_p4, %p2156_p1 }
  0x60   : > { %p2152_p0 = pneg %p2151_p6 }
  0x62   : > { %p2159_p9 = pnand %p2158_p7, %p2152_p0 }
  0x64   : > { %2162 = shalt.err (!%p2159_p9)
}
  0x65   : > { %1910 = dma.hbm_to_vmem [thread:$0]  (!%p2328_p5), %s2522_s7, 1024, %s325_s25, [#allocation13], %s2538_s23, %s2538_s23, %s2232_s22  }
  0x66   : > { %p2539_p3 = scmp.ne.s32.totalorder %s2534_s16, 0 }
  0x67   : > { %p2540_p8 = scmp.ne.s32.totalorder (!%p2539_p3), %s2533_s15, 0 }
  0x68   : > { %343 = sbr.rel (%p2539_p3) target bundleno = 1243 (0x4db), region = 56 }
  0x6f   : > { %2202 = dma.done.wait (%p2540_p8), [#allocation7], 448  }
  0x70   : > { %2204 = vsyncadd (%p2540_p8), [#allocation7], 4294966848 }
  0x71   : > { %2206 = dma.done.wait (%p2540_p8), [#allocation10], 8192  }
  0x72   : > { %2208 = vsyncadd (%p2540_p8), [#allocation10], 4294959104 }
  0x73   : > { %2210 = dma.done.wait (%p2540_p8), [#allocation13], 1024  }
  0x74   : > { %2212 = vsyncadd (%p2540_p8), [#allocation13], 4294966272  ;;  %v1960_v0 = vld [vmem:[#allocation9 + $0x40] sm:$0xff]   ;;  %v1964_v4 = vld [vmem:[#allocation9 + $0x48] sm:$0xff]   ;;  %v2235_v39 = vmov 0.0   ;;  %vm2236_vm0 = vmmov 0  }
  0x75   : > { %v1961_v1 = vld [vmem:[#allocation9 + $0xc0] sm:$0xff]   ;;  %1696 = vmatprep.subr.bf16.mxu0 %v1960_v0  ;;  %v1965_v5 = vld [vmem:[#allocation9 + $0xc8] sm:$0xff]   ;;  %v1968_v8 = vld [vmem:[#allocation9 + $0x50] sm:$0xff]   ;;  %p1019_p5 = scmp.eq.s32.totalorder %s2219_s30, 0 }
  0x76   : > { %v1962_v2 = vld [vmem:[#allocation9] sm:$0xff]   ;;  %1718 = vmatprep.subr.bf16.mxu1 %v1961_v1  ;;  %v1966_v6 = vld [vmem:[#allocation9 + $0x8] sm:$0xff]   ;;  %v1969_v9 = vld [vmem:[#allocation9 + $0xd0] sm:$0xff]  }
  0x77   : > { %v1963_v3 = vld [vmem:[#allocation9 + $0x80] sm:$0xff]   ;;  %1697 = vmatpush3.bf16.msra.mxu0 %v1962_v2  ;;  %v1967_v7 = vld [vmem:[#allocation9 + $0x88] sm:$0xff]   ;;  %v1970_v10 = vld [vmem:[#allocation9 + $0x10] sm:$0xff]  }
  0x78   : > { %1719 = vmatpush3.bf16.msra.mxu1 %v1963_v3  ;;  %1698 = vmatprep.subr.bf16.mxu0 %v1964_v4  ;;  %v1971_v11 = vld [vmem:[#allocation9 + $0x90] sm:$0xff]   ;;  %v1972_v12 = vld [vmem:[#allocation9 + $0x58] sm:$0xff]   ;;  %v1976_v16 = vld [vmem:[#allocation9 + $0x60] sm:$0xff]  }
  0x79   : > { %1720 = vmatprep.subr.bf16.mxu1 %v1965_v5  ;;  %v1973_v13 = vld [vmem:[#allocation9 + $0xd8] sm:$0xff]   ;;  %v1977_v17 = vld [vmem:[#allocation9 + $0xe0] sm:$0xff]   ;;  %v1980_v20 = vld [vmem:[#allocation9 + $0x68] sm:$0xff]  }
  0x7a   : > { %v1974_v14 = vld [vmem:[#allocation9 + $0x18] sm:$0xff]   ;;  %v1978_v18 = vld [vmem:[#allocation9 + $0x20] sm:$0xff]   ;;  %v1981_v21 = vld [vmem:[#allocation9 + $0xe8] sm:$0xff]  }
  0x7b   : > { %1699 = vmatpush3.bf16.msra.mxu0 %v1966_v6  ;;  %v1975_v15 = vld [vmem:[#allocation9 + $0x98] sm:$0xff]   ;;  %v1979_v19 = vld [vmem:[#allocation9 + $0xa0] sm:$0xff]   ;;  %v1982_v22 = vld [vmem:[#allocation9 + $0x28] sm:$0xff]  }
  0x7c   : > { %1721 = vmatpush3.bf16.msra.mxu1 %v1967_v7  ;;  %1700 = vmatprep.subr.bf16.mxu0 %v1968_v8  ;;  %v1983_v23 = vld [vmem:[#allocation9 + $0xa8] sm:$0xff]   ;;  %v1984_v24 = vld [vmem:[#allocation9 + $0x70] sm:$0xff]   ;;  %v1988_v28 = vld [vmem:[#allocation9 + $0x78] sm:$0xff]  }
  0x7d   : > { %1722 = vmatprep.subr.bf16.mxu1 %v1969_v9  ;;  %v1985_v25 = vld [vmem:[#allocation9 + $0xf0] sm:$0xff]   ;;  %v1989_v29 = vld [vmem:[#allocation9 + $0xf8] sm:$0xff]   ;;  %v382_v32 = vld [vmem:[#allocation6] sm:$0xff] }
  0x7e   : > { %v1986_v26 = vld [vmem:[#allocation9 + $0x30] sm:$0xff]   ;;  %v1990_v30 = vld [vmem:[#allocation9 + $0x38] sm:$0xff]   ;;  %v1589_v34 = vcombine.low %v382_v32, %v382_v32  ;;  %v1590_v35 = vcombine.high %v382_v32, %v382_v32  ;;  %v1996_v38 = vld [vmem:[#allocation9 + $0x140] sm:$0xff]  }
  0x7f   : > { %1701 = vmatpush3.bf16.msra.mxu0 %v1970_v10  ;;  %v1987_v27 = vld [vmem:[#allocation9 + $0xb0] sm:$0xff]   ;;  %v1991_v31 = vld [vmem:[#allocation9 + $0xb8] sm:$0xff]   ;;  %v1997_v40 = vld [vmem:[#allocation9 + $0x100] sm:$0xff]  }
  0x80   : > { %1723 = vmatpush3.bf16.msra.mxu1 %v1971_v11  ;;  %1702 = vmatprep.subr.bf16.mxu0 %v1972_v12  ;;  %v383_v33 = vld [vmem:[#allocation6 + $0x8] sm:$0xff]  ;;  %v1998_v41 = vld [vmem:[#allocation9 + $0x180] sm:$0xff]   ;;  %v2005_v48 = vld [vmem:[#allocation9 + $0x158] sm:$0xff]  }
  0x81   : > { %1724 = vmatprep.subr.bf16.mxu1 %v1973_v13  ;;  %v1591_v36 = vcombine.low %v383_v33, %v383_v33  ;;  %v1592_v37 = vcombine.high %v383_v33, %v383_v33  ;;  %891 = vmatprep.mubr.bf16.mxu0 %v1590_v35  ;;  %v1999_v42 = vld [vmem:[#allocation9 + $0x148] sm:$0xff]   ;;  %v2002_v45 = vld [vmem:[#allocation9 + $0x150] sm:$0xff]   ;;  %v2007_v49 = vld [vmem:[#allocation9 + $0x198] sm:$0xff]  }
  0x82   : > { %v2000_v43 = vld [vmem:[#allocation9 + $0x108] sm:$0xff]   ;;  %v2004_v46 = vld [vmem:[#allocation9 + $0x190] sm:$0xff]   ;;  %v2006_v50 = vld [vmem:[#allocation9 + $0x118] sm:$0xff]  }
  0x83   : > { %1703 = vmatpush3.bf16.msra.mxu0 %v1974_v14  ;;  %931 = vmatprep.mubr.bf16.mxu1 %v1592_v37  ;;  %v2001_v44 = vld [vmem:[#allocation9 + $0x188] sm:$0xff]   ;;  %v2003_v47 = vld [vmem:[#allocation9 + $0x110] sm:$0xff]   ;;  %v2008_v51 = vld [vmem:[#allocation9 + $0x160] sm:$0xff]  }
  0x84   : > { %1725 = vmatpush3.bf16.msra.mxu1 %v1975_v15  ;;  %1704 = vmatprep.subr.bf16.mxu0 %v1976_v16  ;;  %v2010_v52 = vld [vmem:[#allocation9 + $0x1a0] sm:$0xff]   ;;  %v2011_v54 = vld [vmem:[#allocation9 + $0x168] sm:$0xff]   ;;  %v2014_v57 = vld [vmem:[#allocation9 + $0x170] sm:$0xff]  }
  0x85   : > { %1726 = vmatprep.subr.bf16.mxu1 %v1977_v17  ;;  %v2009_v53 = vld [vmem:[#allocation9 + $0x120] sm:$0xff]   ;;  %v2013_v55 = vld [vmem:[#allocation9 + $0x1a8] sm:$0xff]   ;;  %v384_v58 = vld [vmem:[#allocation6 + $0x10] sm:$0xff] }
  0x86   : > { %v2012_v56 = vld [vmem:[#allocation9 + $0x128] sm:$0xff]   ;;  %v2016_v59 = vld [vmem:[#allocation9 + $0x1b0] sm:$0xff]   ;;  %v1594_v60 = vcombine.high %v384_v58, %v384_v58  ;;  %v2017_v62 = vld [vmem:[#allocation9 + $0x178] sm:$0xff]   ;;  %v1593_v2 = vcombine.low %v384_v58, %v384_v58 }
  0x87   : > { %1705 = vmatpush3.bf16.msra.mxu0 %v1978_v18  ;;  %v2015_v61 = vld [vmem:[#allocation9 + $0x130] sm:$0xff]   ;;  %v2019_v63 = vld [vmem:[#allocation9 + $0x1b8] sm:$0xff]  }
  0x88   : > { %1727 = vmatpush3.bf16.msra.mxu1 %v1979_v19  ;;  %1706 = vmatprep.subr.bf16.mxu0 %v1980_v20  ;;  %v2018_v0 = vld [vmem:[#allocation9 + $0x138] sm:$0xff]  }
  0x89   : > { %1728 = vmatprep.subr.bf16.mxu1 %v1981_v21  ;;  %v2022_v1 = vld [vmem:[#allocation6 + $0x18] ss:$0 sps:$4 sm:$0xff]  }
  0x8b   : > { %1707 = vmatpush3.bf16.msra.mxu0 %v1982_v22 }
  0x8c   : > { %1729 = vmatpush3.bf16.msra.mxu1 %v1983_v23  ;;  %1708 = vmatprep.subr.bf16.mxu0 %v1984_v24 }
  0x8d   : > { %1730 = vmatprep.subr.bf16.mxu1 %v1985_v25  ;;  %v2237_v25 = vmov (%p1019_p5), 0.0  }
  0x8e   : > { %1025 = vst [vmem:[#allocation2] sm:$0x3] (%p1019_p5), %v2237_v25 }
  0x8f   : > { %1709 = vmatpush3.bf16.msra.mxu0 %v1986_v26 }
  0x90   : > { %1731 = vmatpush3.bf16.msra.mxu1 %v1987_v27  ;;  %1710 = vmatprep.subr.bf16.mxu0 %v1988_v28 }
  0x91   : > { %1732 = vmatprep.subr.bf16.mxu1 %v1989_v29 }
  0x93   : > { %1711 = vmatpush3.bf16.msra.mxu0 %v1990_v30 }
  0x94   : > { %1733 = vmatpush3.bf16.msra.mxu1 %v1991_v31  ;;  %1740 = vmatprep.subr.bf16.mxu0 %v1996_v38 }
  0x95   : > { %1798 = vmatprep.subr.bf16.mxu1 %v2235_v39 }
  0x96   : > { %892 = vmatmul.mubr.bf16.vlgmr.msra.gmra.mrb[0].mxu0 %v1589_v34 }
  0x97   : > { %932 = vmatmul.mubr.bf16.vlgmr.msra.gmra.mrb[0].mxu1 %v1591_v36  ;;  %1741 = vmatpush3.bf16.msra.mxu0 %v1997_v40 }
  0x98   : > { %1799 = vmatpush3.bf16.msra.mxu1 %v1998_v41  ;;  %1742 = vmatprep.subr.bf16.mxu0 %v1999_v42 }
  0x99   : > { %1800 = vmatprep.subr.bf16.mxu1 %v2235_v39  ;;  %1814 = vmatprep.mubr.msk.bf16.mxu1 %vm2236_vm0, %v2235_v39 }
  0x9a   : > { %971 = vmatprep.mubr.bf16.mxu0 %v1594_v60 }
  0x9b   : > { %1743 = vmatpush3.bf16.msra.mxu0 %v2000_v43 }
  0x9c   : > { %1801 = vmatpush3.bf16.msra.mxu1 %v2001_v44  ;;  %1744 = vmatprep.subr.bf16.mxu0 %v2002_v45 }
  0x9d   : > { %1802 = vmatprep.subr.bf16.mxu1 %v2235_v39 }
  0x9f   : > { %1745 = vmatpush3.bf16.msra.mxu0 %v2003_v47 }
  0xa0   : > { %1803 = vmatpush3.bf16.msra.mxu1 %v2004_v46  ;;  %1746 = vmatprep.subr.bf16.mxu0 %v2005_v48 }
  0xa1   : > { %1804 = vmatprep.subr.bf16.mxu1 %v2235_v39 }
  0xa3   : > { %1747 = vmatpush3.bf16.msra.mxu0 %v2006_v50 }
  0xa4   : > { %1805 = vmatpush3.bf16.msra.mxu1 %v2007_v49  ;;  %1748 = vmatprep.subr.bf16.mxu0 %v2008_v51 }
  0xa5   : > { %1806 = vmatprep.subr.bf16.mxu1 %v2235_v39 }
  0xa7   : > { %1749 = vmatpush3.bf16.msra.mxu0 %v2009_v53 }
  0xa8   : > { %1807 = vmatpush3.bf16.msra.mxu1 %v2010_v52  ;;  %1750 = vmatprep.subr.bf16.mxu0 %v2011_v54 }
  0xa9   : > { %1808 = vmatprep.subr.bf16.mxu1 %v2235_v39 }
  0xab   : > { %1751 = vmatpush3.bf16.msra.mxu0 %v2012_v56 }
  0xac   : > { %1809 = vmatpush3.bf16.msra.mxu1 %v2013_v55  ;;  %1752 = vmatprep.subr.bf16.mxu0 %v2014_v57 }
  0xad   : > { %1810 = vmatprep.subr.bf16.mxu1 %v2235_v39 }
  0xaf   : > { %1753 = vmatpush3.bf16.msra.mxu0 %v2015_v61 }
  0xb0   : > { %1811 = vmatpush3.bf16.msra.mxu1 %v2016_v59  ;;  %1754 = vmatprep.subr.bf16.mxu0 %v2017_v62 }
  0xb1   : > { %1812 = vmatprep.subr.bf16.mxu1 %v2235_v39 }
  0xb3   : > { %1755 = vmatpush3.bf16.msra.mxu0 %v2018_v0 }
  0xb4   : > { %1813 = vmatpush3.bf16.msra.mxu1 %v2019_v63 }
  0xb6   : > { %972 = vmatmul.mubr.bf16.vlgmr.msra.gmra.mrb[4].mxu0 %v1593_v2 }
  0xb7   : > { %1815 = vmatmul.mubr.bf16.vlgmr.msra.gmra.mrb[4].mxu1 %v2022_v1 }
 0x169   : > { %v1712_v3 = vpop.f32.mrb[0].mxu0 }
 0x16a   : > { %v1734_v4 = vpop.f32.mrb[0].mxu1  ;;  %v1713_v5 = vpop.f32.mrb[1].mxu0 }
 0x16b   : > { %v1735_v6 = vpop.f32.mrb[1].mxu1  ;;  %v1714_v7 = vadd.f32 %v1713_v5, %v1712_v3  ;;  %v1715_v9 = vpop.f32.mrb[2].mxu0 }
 0x16c   : > { %v1736_v8 = vadd.f32 %v1735_v6, %v1734_v4  ;;  %v1737_v10 = vpop.f32.mrb[2].mxu1  ;;  %v1716_v11 = vpop.f32.mrb[3].mxu0 }
 0x16d   : > { %v1738_v12 = vpop.f32.mrb[3].mxu1 }
 0x16e   : > { %v934_v13 = vadd.f32 %v1736_v8, %v1714_v7 }
 0x189   : > { %v1756_v15 = vpop.f32.mrb[4].mxu0  ;;  %1024 = sbr.rel (!%p1019_p5) target bundleno = 400 (0x190), region = 76 }
 0x18a   : > { %v1013_v14 = vpop.f32.mrb[4].mxu1  ;;  %v1757_v17 = vpop.f32.mrb[5].mxu0 }
 0x18b   : > { %v1816_v16 = vpop.f32.mrb[5].mxu1  ;;  %v1758_v19 = vadd.f32 %v1757_v17, %v1756_v15  ;;  %v1759_v20 = vpop.f32.mrb[6].mxu0 }
 0x18c   : > { %v1016_v18 = vpop.f32.mrb[6].mxu1  ;;  %v1760_v22 = vpop.f32.mrb[7].mxu0 }
 0x18d   : > { %v1817_v21 = vpop.f32.mrb[7].mxu1  ;;  %v974_v23 = vadd.f32 %v1758_v19, %v934_v13 }
 0x18f   : > { %v2448_v24 = vadd.f32 %v1013_v14, %v974_v23 }
 0x190 PF: > { %p1653_p2 = scmp.ne.s32.totalorder %s2219_s30, 0 }
 0x191   : > { %v1030_v26 = vrot.slane (!%p1653_p2), %v2448_v24, 4  ;;  %v1039_v27 = vmul.f32 (!%p1653_p2), %v2448_v24, %v2448_v24  ;;  %v1029_v36 = vld [vmem:[#allocation2] sm:$0x1] (!%p1653_p2)  ;;  %v1038_v39 = vld [vmem:[#allocation2 + $0x1] sm:$0x1] (!%p1653_p2) }
 0x192   : > { %1028 = sbr.rel (%p1653_p2) target bundleno = 418 (0x1a2), region = 80 }
 0x193   : > { %v1031_v28 = vadd.f32 (!%p1653_p2), %v1030_v26, %v2448_v24  ;;  %v1040_v29 = vrot.slane (!%p1653_p2), %v1039_v27, 4 }
 0x195   : > { %v1032_v30 = vrot.slane (!%p1653_p2), %v1031_v28, 2  ;;  %v1041_v31 = vadd.f32 (!%p1653_p2), %v1040_v29, %v1039_v27 }
 0x197   : > { %v1033_v32 = vadd.f32 (!%p1653_p2), %v1032_v30, %v1031_v28  ;;  %v1042_v33 = vrot.slane (!%p1653_p2), %v1041_v31, 2 }
 0x199   : > { %v1034_v34 = vrot.slane %v1033_v32, 1  ;;  %v1043_v35 = vadd.f32 %v1042_v33, %v1041_v31 }
 0x19b   : > { %v1035_v37 = vadd.f32 %v1034_v34, %v1033_v32  ;;  %v1044_v38 = vrot.slane %v1043_v35, 1 }
 0x19d   : > { %v1036_v40 = vadd.f32 %v1035_v37, %v1029_v36  ;;  %v1045_v41 = vadd.f32 %v1044_v38, %v1043_v35 }
 0x19f   : > { %1037 = vst [vmem:[#allocation2] sm:$0x1] %v1036_v40  ;;  %v1046_v42 = vadd.f32 %v1045_v41, %v1038_v39 }
 0x1a1   : > { %1047 = vst [vmem:[#allocation2 + $0x1] sm:$0x1] %v1046_v42 }
 0x1a2 PF: > { %p1048_p10 = scmp.eq.s32.totalorder %s2219_s30, 1 }
 0x1a3   : > { %v2238_v47 = vmov (%p1048_p10), 0.0   ;;  %v1060_v52 = vld [vmem:[%s2517_s2] sm:$0x1] (%p1048_p10) }
 0x1a4   : > { %1052 = sbr.rel (!%p1048_p10) target bundleno = 451 (0x1c3), region = 84  ;;  %1069 = vst [vmem:[#allocation3] sm:$0x3] (%p1048_p10), %v2238_v47  ;;  %v1064_v55 = vld [vmem:[%s2518_s3] sm:$0x1] (%p1048_p10) }
 0x1a6   : > { %v1053_v43 = vld [vmem:[#allocation2] sm:$0x1] (%p1048_p10) }
 0x1a7   : > { %v1054_v45 = vmul.f32 (%p1048_p10), 0.125, %v1053_v43 }
 0x1a8   : > { %v1055_v44 = vld [vmem:[#allocation2 + $0x1] sm:$0x1] (%p1048_p10) }
 0x1a9   : > { %v1056_v46 = vmul.f32 (%p1048_p10), 0.125, %v1055_v44  ;;  %v1057_v48 = vmul.f32 (%p1048_p10), %v1054_v45, %v1054_v45 }
 0x1ab   : > { %v1058_v49 = vsub.f32 %v1056_v46, %v1057_v48 }
 0x1ad   : > { %v1059_v50 = vmax.f32 %v1058_v49, 0.0 }
 0x1af   : > { %v1061_v51 = vadd.f32 1e-05, %v1059_v50 }
 0x1b1   : > { %2023 = vrsqrt.f32 %v1061_v51 }
 0x1bb   : > { %v2024_v53 = vpop.eup %2023 }
 0x1bc   : > { %v1063_v54 = vmul.f32 %v2024_v53, %v1060_v52 }
 0x1be   : > { %1067 = vst [vmem:[#allocation4] sm:$0x1] %v1063_v54  ;;  %v1065_v56 = vmul.f32 %v1063_v54, %v1054_v45 }
 0x1c0   : > { %v1066_v57 = vsub.f32 %v1064_v55, %v1065_v56 }
 0x1c2   : > { %1068 = vst [vmem:[#allocation4 + $0x1] sm:$0x1] %v1066_v57 }
 0x1c3 PF: > { %p1655_p11 = scmp.ne.s32.totalorder %s2219_s30, 1 }
 0x1c4   : > { %v2025_v58 = vld [vmem:[#allocation11] sm:$0xff] (!%p1655_p11)   ;;  %v2239_v59 = vmov (!%p1655_p11), 0.0   ;;  %v2026_v60 = vld [vmem:[#allocation11 + $0x8] sm:$0xff] (!%p1655_p11)   ;;  %vm2240_vm1 = vmmov (!%p1655_p11), 0   ;;  %v2027_v61 = vld [vmem:[#allocation11 + $0x10] sm:$0xff] (!%p1655_p11)  }
 0x1c5   : > { %1072 = sbr.rel (%p1655_p11) target bundleno = 714 (0x2ca), region = 88  ;;  %1818 = vmatprep.subr.bf16.mxu0 (!%p1655_p11), %v2239_v59  ;;  %1834 = vmatprep.mubr.msk.bf16.mxu0 (!%p1655_p11), %vm2240_vm1, %v2239_v59  ;;  %v2028_v62 = vld [vmem:[#allocation11 + $0x18] sm:$0xff] (!%p1655_p11)   ;;  %v2029_v63 = vld [vmem:[#allocation11 + $0x20] sm:$0xff] (!%p1655_p11)   ;;  %v2030_v2 = vld [vmem:[#allocation11 + $0x28] sm:$0xff] (!%p1655_p11)  }
 0x1c6   : > { %1819 = vmatpush3.bf16.msra.mxu0 (!%p1655_p11), %v2025_v58  ;;  %v1656_v0 = vld [vmem:[#allocation4] ss:$0 sm:$0xff] (!%p1655_p11)  ;;  %v2031_v5 = vld [vmem:[#allocation11 + $0x30] sm:$0xff] (!%p1655_p11)   ;;  %v2032_v7 = vld [vmem:[#allocation11 + $0x38] sm:$0xff] (!%p1655_p11)  }
 0x1c7   : > { %1820 = vmatprep.subr.bf16.mxu0 (!%p1655_p11), %v2239_v59  ;;  %v1078_v1 = vmul.f32 (!%p1655_p11), %v1656_v0, %v2448_v24  ;;  %v1200_v23 = vld [vmem:[#allocation3] sm:$0x1] (!%p1655_p11)  ;;  %v1209_v27 = vld [vmem:[#allocation3 + $0x1] sm:$0x1] (!%p1655_p11) }
 0x1c9   : > { %v1657_v3 = vld [vmem:[#allocation4 + $0x1] ss:$0 sm:$0xff] (!%p1655_p11) }
 0x1ca   : > { %1821 = vmatpush3.bf16.msra.mxu0 (!%p1655_p11), %v2026_v60  ;;  %v1084_v4 = vadd.f32 (!%p1655_p11), %v1657_v3, %v1078_v1 }
 0x1cb   : > { %1822 = vmatprep.subr.bf16.mxu0 (!%p1655_p11), %v2239_v59 }
 0x1cc   : > { %v1085_v6 = vmax.f32 %v1084_v4, 0.0 }
 0x1ce   : > { %1823 = vmatpush3.bf16.msra.mxu0 %v2027_v61  ;;  %v1095_v8 = vpack.c.bf16 %v1085_v6, %v1085_v6 }
 0x1cf   : > { %1824 = vmatprep.subr.bf16.mxu0 %v2239_v59 }
 0x1d2   : > { %1825 = vmatpush3.bf16.msra.mxu0 %v2028_v62 }
 0x1d3   : > { %1826 = vmatprep.subr.bf16.mxu0 %v2239_v59 }
 0x1d6   : > { %1827 = vmatpush3.bf16.msra.mxu0 %v2029_v63 }
 0x1d7   : > { %1828 = vmatprep.subr.bf16.mxu0 %v2239_v59 }
 0x1da   : > { %1829 = vmatpush3.bf16.msra.mxu0 %v2030_v2 }
 0x1db   : > { %1830 = vmatprep.subr.bf16.mxu0 %v2239_v59 }
 0x1de   : > { %1831 = vmatpush3.bf16.msra.mxu0 %v2031_v5 }
 0x1df   : > { %1832 = vmatprep.subr.bf16.mxu0 %v2239_v59 }
 0x1e2   : > { %1833 = vmatpush3.bf16.msra.mxu0 %v2032_v7 }
 0x1e5   : > { %1835 = vmatmul.mubr.bf16.vlgmr.msra.gmra.mrb[0].mxu0 %v1095_v8 }
 0x2b8   : > { %v1194_v9 = vpop.f32.mrb[0].mxu0 }
 0x2b9   : > { %v1201_v10 = vrot.slane %v1194_v9, 4  ;;  %v1210_v11 = vmul.f32 %v1194_v9, %v1194_v9  ;;  %v1836_v12 = vpop.f32.mrb[1].mxu0 }
 0x2ba   : > { %v1197_v13 = vpop.f32.mrb[2].mxu0 }
 0x2bb   : > { %v1202_v14 = vadd.f32 %v1201_v10, %v1194_v9  ;;  %v1211_v15 = vrot.slane %v1210_v11, 4  ;;  %v1837_v16 = vpop.f32.mrb[3].mxu0 }
 0x2bd   : > { %v1203_v17 = vrot.slane %v1202_v14, 2  ;;  %v1212_v18 = vadd.f32 %v1211_v15, %v1210_v11 }
 0x2bf   : > { %v1204_v19 = vadd.f32 %v1203_v17, %v1202_v14  ;;  %v1213_v20 = vrot.slane %v1212_v18, 2 }
 0x2c1   : > { %v1205_v21 = vrot.slane %v1204_v19, 1  ;;  %v1214_v22 = vadd.f32 %v1213_v20, %v1212_v18 }
 0x2c3   : > { %v1206_v25 = vadd.f32 %v1205_v21, %v1204_v19  ;;  %v1215_v26 = vrot.slane %v1214_v22, 1 }
 0x2c5   : > { %v1207_v28 = vadd.f32 %v1206_v25, %v1200_v23  ;;  %v1216_v29 = vadd.f32 %v1215_v26, %v1214_v22 }
 0x2c7   : > { %1208 = vst [vmem:[#allocation3] sm:$0x1] %v1207_v28  ;;  %v1217_v30 = vadd.f32 %v1216_v29, %v1209_v27 }
 0x2c9   : > { %1218 = vst [vmem:[#allocation3 + $0x1] sm:$0x1] %v1217_v30 }
 0x2ca PF: > { %p1219_p12 = scmp.eq.s32.totalorder %s2219_s30, 2 }
 0x2cb   : > { %v1231_v39 = vld [vmem:[%s2520_s5] sm:$0x1] (%p1219_p12) }
 0x2cc   : > { %1223 = sbr.rel (!%p1219_p12) target bundleno = 747 (0x2eb), region = 92  ;;  %v1235_v42 = vld [vmem:[%s2521_s6] sm:$0x1] (%p1219_p12) }
 0x2ce   : > { %v1224_v31 = vld [vmem:[#allocation3] sm:$0x1] (%p1219_p12) }
 0x2cf   : > { %v1225_v33 = vmul.f32 (%p1219_p12), 0.125, %v1224_v31 }
 0x2d0   : > { %v1226_v32 = vld [vmem:[#allocation3 + $0x1] sm:$0x1] (%p1219_p12) }
 0x2d1   : > { %v1227_v34 = vmul.f32 (%p1219_p12), 0.125, %v1226_v32  ;;  %v1228_v35 = vmul.f32 (%p1219_p12), %v1225_v33, %v1225_v33 }
 0x2d3   : > { %v1229_v36 = vsub.f32 %v1227_v34, %v1228_v35 }
 0x2d5   : > { %v1230_v37 = vmax.f32 %v1229_v36, 0.0 }
 0x2d7   : > { %v1232_v38 = vadd.f32 1e-05, %v1230_v37 }
 0x2d9   : > { %2033 = vrsqrt.f32 %v1232_v38 }
 0x2e3   : > { %v2034_v40 = vpop.eup %2033 }
 0x2e4   : > { %v1234_v41 = vmul.f32 %v2034_v40, %v1231_v39 }
 0x2e6   : > { %1238 = vst [vmem:[#allocation5] sm:$0x1] %v1234_v41  ;;  %v1236_v43 = vmul.f32 %v1234_v41, %v1225_v33 }
 0x2e8   : > { %v1237_v44 = vsub.f32 %v1235_v42, %v1236_v43 }
 0x2ea   : > { %1239 = vst [vmem:[#allocation5 + $0x1] sm:$0x1] %v1237_v44 }
 0x2eb PF: > { %p1667_p13 = scmp.ne.s32.totalorder %s2219_s30, 2 }
 0x2ec   : > { %v2035_v45 = vld [vmem:[#allocation11] sm:$0xff] (!%p1667_p13)   ;;  %v2241_v46 = vmov (!%p1667_p13), 0.0   ;;  %v2036_v47 = vld [vmem:[#allocation11 + $0x8] sm:$0xff] (!%p1667_p13)   ;;  %vm2242_vm2 = vmmov (!%p1667_p13), 0   ;;  %v2037_v48 = vld [vmem:[#allocation11 + $0x10] sm:$0xff] (!%p1667_p13)  }
 0x2ed   : > { %1242 = sbr.rel (%p1667_p13) target bundleno = 1218 (0x4c2), region = 96  ;;  %1838 = vmatprep.subr.bf16.mxu0 (!%p1667_p13), %v2241_v46  ;;  %1858 = vmatprep.subr.bf16.mxu1 (!%p1667_p13), %v2241_v46  ;;  %v2043_v49 = vld [vmem:[#allocation12] sm:$0xff] (!%p1667_p13)   ;;  %v2038_v50 = vld [vmem:[#allocation11 + $0x18] sm:$0xff] (!%p1667_p13)   ;;  %v2044_v51 = vld [vmem:[#allocation12 + $0x8] sm:$0xff] (!%p1667_p13)  }
 0x2ee   : > { %1839 = vmatpush3.bf16.msra.mxu0 (!%p1667_p13), %v2035_v45  ;;  %1854 = vmatprep.mubr.msk.bf16.mxu0 (!%p1667_p13), %vm2242_vm2, %v2241_v46  ;;  %v2039_v52 = vld [vmem:[#allocation11 + $0x20] sm:$0xff] (!%p1667_p13)   ;;  %v2045_v54 = vld [vmem:[#allocation12 + $0x10] sm:$0xff] (!%p1667_p13)   ;;  %v2040_v56 = vld [vmem:[#allocation11 + $0x28] sm:$0xff] (!%p1667_p13)  }
 0x2ef   : > { %1840 = vmatprep.subr.bf16.mxu0 (!%p1667_p13), %v2241_v46  ;;  %1874 = vmatprep.mubr.msk.bf16.mxu1 (!%p1667_p13), %vm2242_vm2, %v2241_v46  ;;  %v1668_v53 = vld [vmem:[#allocation4] ss:$0 sm:$0xff] (!%p1667_p13)  ;;  %v1669_v57 = vld [vmem:[#allocation4 + $0x1] ss:$0 sm:$0xff] (!%p1667_p13)  ;;  %v2046_v58 = vld [vmem:[#allocation12 + $0x18] sm:$0xff] (!%p1667_p13)  }
 0x2f0   : > { %1859 = vmatpush3.bf16.msra.mxu1 (!%p1667_p13), %v2043_v49  ;;  %v1248_v55 = vmul.f32 (!%p1667_p13), %v1668_v53, %v2448_v24  ;;  %v2041_v60 = vld [vmem:[#allocation11 + $0x30] sm:$0xff] (!%p1667_p13)   ;;  %v2047_v61 = vld [vmem:[#allocation12 + $0x20] sm:$0xff] (!%p1667_p13)   ;;  %v2042_v63 = vld [vmem:[#allocation11 + $0x38] sm:$0xff] (!%p1667_p13)  }
 0x2f1   : > { %1860 = vmatprep.subr.bf16.mxu1 (!%p1667_p13), %v2241_v46  ;;  %v2048_v24 = vld [vmem:[#allocation12 + $0x28] sm:$0xff] (!%p1667_p13)   ;;  %v2049_v1 = vld [vmem:[#allocation12 + $0x30] sm:$0xff] (!%p1667_p13)   ;;  %v2050_v2 = vld [vmem:[#allocation12 + $0x38] sm:$0xff] (!%p1667_p13)  }
 0x2f2   : > { %1841 = vmatpush3.bf16.msra.mxu0 (!%p1667_p13), %v2036_v47  ;;  %v1254_v59 = vadd.f32 (!%p1667_p13), %v1669_v57, %v1248_v55  ;;  %v1678_v3 = vld [vmem:[#allocation5] ss:$0 sm:$0xff] (!%p1667_p13)  ;;  %v1679_v5 = vld [vmem:[#allocation5 + $0x1] ss:$0 sm:$0xff] (!%p1667_p13)  ;;  %v1680_v13 = vld [vmem:[%s2523_s8] ss:$0 sm:$0xff] (!%p1667_p13) }
 0x2f3   : > { %1842 = vmatprep.subr.bf16.mxu0 (!%p1667_p13), %v2241_v46 }
 0x2f4   : > { %1861 = vmatpush3.bf16.msra.mxu1 %v2044_v51  ;;  %v1255_v62 = vmax.f32 %v1254_v59, 0.0 }
 0x2f5   : > { %1862 = vmatprep.subr.bf16.mxu1 %v2241_v46 }
 0x2f6   : > { %1843 = vmatpush3.bf16.msra.mxu0 %v2037_v48  ;;  %v1256_v0 = vpack.c.bf16 %v1255_v62, %v1255_v62 }
 0x2f7   : > { %1844 = vmatprep.subr.bf16.mxu0 %v2241_v46 }
 0x2f8   : > { %1863 = vmatpush3.bf16.msra.mxu1 %v2045_v54 }
 0x2f9   : > { %1864 = vmatprep.subr.bf16.mxu1 %v2241_v46 }
 0x2fa   : > { %1845 = vmatpush3.bf16.msra.mxu0 %v2038_v50 }
 0x2fb   : > { %1846 = vmatprep.subr.bf16.mxu0 %v2241_v46 }
 0x2fc   : > { %1865 = vmatpush3.bf16.msra.mxu1 %v2046_v58 }
 0x2fd   : > { %1866 = vmatprep.subr.bf16.mxu1 %v2241_v46 }
 0x2fe   : > { %1847 = vmatpush3.bf16.msra.mxu0 %v2039_v52 }
 0x2ff   : > { %1848 = vmatprep.subr.bf16.mxu0 %v2241_v46 }
 0x300   : > { %1867 = vmatpush3.bf16.msra.mxu1 %v2047_v61 }
 0x301   : > { %1868 = vmatprep.subr.bf16.mxu1 %v2241_v46 }
 0x302   : > { %1849 = vmatpush3.bf16.msra.mxu0 %v2040_v56 }
 0x303   : > { %1850 = vmatprep.subr.bf16.mxu0 %v2241_v46 }
 0x304   : > { %1869 = vmatpush3.bf16.msra.mxu1 %v2048_v24 }
 0x305   : > { %1870 = vmatprep.subr.bf16.mxu1 %v2241_v46 }
 0x306   : > { %1851 = vmatpush3.bf16.msra.mxu0 %v2041_v60 }
 0x307   : > { %1852 = vmatprep.subr.bf16.mxu0 %v2241_v46 }
 0x308   : > { %1871 = vmatpush3.bf16.msra.mxu1 %v2049_v1 }
 0x309   : > { %1872 = vmatprep.subr.bf16.mxu1 %v2241_v46 }
 0x30a   : > { %1853 = vmatpush3.bf16.msra.mxu0 %v2042_v63 }
 0x30c   : > { %1873 = vmatpush3.bf16.msra.mxu1 %v2050_v2 }
 0x30d   : > { %1855 = vmatmul.mubr.bf16.vlgmr.msra.gmra.mrb[0].mxu0 %v1256_v0 }
 0x3e0   : > { %v1355_v4 = vpop.f32.mrb[0].mxu0 }
 0x3e1   : > { %v1366_v6 = vmul.f32 %v1678_v3, %v1355_v4  ;;  %v1856_v7 = vpop.f32.mrb[1].mxu0 }
 0x3e2   : > { %v1358_v8 = vpop.f32.mrb[2].mxu0 }
 0x3e3   : > { %v1372_v9 = vadd.f32 %v1679_v5, %v1366_v6  ;;  %v1857_v10 = vpop.f32.mrb[3].mxu0 }
 0x3e5   : > { %v1373_v11 = vmax.f32 %v1372_v9, 0.0 }
 0x3e7   : > { %v1374_v12 = vpack.c.bf16 %v1373_v11, %v1373_v11 }
 0x3e9   : > { %1875 = vmatmul.mubr.bf16.vlgmr.msra.gmra.mrb[0].mxu1 %v1374_v12 }
 0x4bc   : > { %v1480_v14 = vpop.f32.mrb[0].mxu1 }
 0x4bd   : > { %v1481_v15 = vadd.f32 %v1680_v13, %v1480_v14  ;;  %v1876_v16 = vpop.f32.mrb[1].mxu1 }
 0x4be   : > { %v1483_v17 = vpop.f32.mrb[2].mxu1 }
 0x4bf   : > { %v1486_v18 = vmax.f32 %v1481_v15, 0.0  ;;  %v1877_v19 = vpop.f32.mrb[3].mxu1 }
 0x4c1   : > { %1487 = vst [vmem:[#allocation14] sm:$0xff] %v1486_v18 }
 0x4c2 PF: > { %s2541_s26 = sadd.s32 4294967295, %s2227_s11   ;;  %s2243_s29 = smov [#allocation14]  }
 0x4c3   : > { %p2480_p6 = scmp.eq.s32.totalorder %s2541_s26, 2  ;;  %s1497_s12 = sshll.u32 %s2243_s29, 4  ;;  %s1498_s12 = int_to_ptr.vmem [resolvable:$true] %s1497_s12 }
 0x4c4   : > { %s2163_s13 = scalar_lea.vmem %s1498_s12, 128  ;;  %p2170_p7 = scmp.lt.s32.totalorder %s1498_s12, %s1498_s12 }
 0x4c5   : > { %p2164_p0 = scmp.ne.s32.totalorder %s1498_s12, %s2163_s13  ;;  %p2171_p9 = scmp.lt.s32.totalorder %s2163_s13, %s2163_s13 }
 0x4c7   : > { %p2165_p1 = pnand %p2164_p0, %p2480_p6  ;;  %p2172_p3 = por %p2171_p9, %p2170_p7 }
 0x4c9   : > { %p2166_p4 = pneg %p2165_p1 }
 0x4cb   : > { %p2173_p8 = pnand %p2172_p3, %p2166_p4 }
 0x4cd   : > { %2176 = shalt.err (!%p2173_p8)
}
 0x4ce   : > { %s2177_s14 = scalar_lea.hbm %s2524_s9, 128 }
 0x4cf   : > { %p2178_p5 = scmp.ne.s32.totalorder %s2524_s9, %s2177_s14  ;;  %p2183_p11 = scmp.lt.u32.totalorder %s2177_s14, %s2524_s9 }
 0x4d1   : > { %p2179_p2 = pnand %p2178_p5, %p2480_p6 }
 0x4d3   : > { %p2180_p10 = pneg %p2179_p2 }
 0x4d5   : > { %p2185_p12 = pnand %p2183_p11, %p2180_p10 }
 0x4d7   : > { %2188 = shalt.err (!%p2185_p12)
}
 0x4d8   : > { %1895 = dma.vmem_to_hbm [thread:$0]  (%p2480_p6), %s1498_s12, 128, %s2524_s9, [#allocation8]  }
 0x4d9   : > { %2214 = dma.done.wait (%p2480_p6), [#allocation8], 128  }
 0x4da   : > { %2216 = vsyncadd (%p2480_p6), [#allocation8], 4294967168 }
 0x4db PF: > { %s23_s11 = sadd.s32 1, %s2227_s11   ;;  %s2543_s30 = sld [smem:[#allocation19_spill]] }
 0x4dc   : > { %p20_p13 = scmp.ge.s32.totalorder %s23_s11, 5   ;;  %s2544_s10 = smov %s2546_s18 }
 0x4de   :  { %22 = sbr.rel (!%p20_p13) target bundleno = 5 (0x5), region = 123 }
 0x4e5   :  { %1510 = vsyncpa [#allocation7], 1 }
 0x4e6   :  { %1512 = vsyncpa [#allocation7 + $0x1], 1 }
 0x4e7   :  { %1513 = vsyncpa [#allocation10], 1 }
 0x4e8   :  { %1514 = vsyncpa [#allocation13], 1 }
 0x4e9   :  { %1515 = vsyncpa [#allocation8], 1 }
 0x4ea   :  { %1517 = vsyncpa [#allocation8 + $0x1], 1 }

</bundles_post_ra>
